<compile_context>
chip_gen: v5e
topology: v5e:2x2
jax: 0.10.0
libtpu: 0.0.40
codegen_flags: <defaults>
</compile_context>

<pallas_src>
import functools

import jax
import jax.numpy as jnp
from jax.experimental import pallas as pl
from jax.experimental.pallas import tpu as pltpu


def _round_up(x, m):
    return (x + m - 1) // m * m


def _head_kernel(batch_ref, x_ref, w1_ref, b1_ref, w2_ref, b2_ref, out_ref,
                 pooled_acc, count_acc, *, mol_tile):
    m = pl.program_id(0)           # molecule-block axis ("parallel")
    i = pl.program_id(1)           # node-tile axis ("arbitrary" reduction)

    @pl.when(i == 0)
    def _():
        pooled_acc[...] = jnp.zeros_like(pooled_acc)
        count_acc[...] = jnp.zeros_like(count_acc)

    # --- MLP layer 1 on this node tile: Linear(d, d) + SiLU (bf16 MXU, f32 acc) ---
    x = x_ref[...]                                                  # [TILE_N, D_pad] bf16
    h = jnp.dot(x, w1_ref[...], preferred_element_type=jnp.float32) + b1_ref[...]
    h = h * jax.nn.sigmoid(h)                                       # SiLU, f32

    # --- pool first: per-tile one-hot scatter-sum of h on the MXU ---
    batch = batch_ref[...]                                          # [1, TILE_N] int32
    rows = jax.lax.broadcasted_iota(jnp.int32, (mol_tile, batch.shape[1]), 0)
    hits = (rows + m * mol_tile) == batch                           # [mol_tile, TILE_N]
    onehot = hits.astype(jnp.bfloat16)                              # 0/1 exact in bf16
    pooled_acc[...] += jnp.dot(onehot, h.astype(jnp.bfloat16),
                               preferred_element_type=jnp.float32)  # [mol_tile, D_pad]
    count_acc[...] += jnp.sum(hits.astype(jnp.float32), axis=1, keepdims=True)

    # --- last node tile: project pooled features, add per-node bias * counts ---
    @pl.when(i == pl.num_programs(1) - 1)
    def _():
        out = jnp.dot(pooled_acc[...], w2_ref[...],
                      preferred_element_type=jnp.float32)           # [mol_tile, C_pad]
        out_ref[...] = out + count_acc[...] * b2_ref[...]


def graph_multiclass_head(x, batch, n_molecules, params, *, tile_n=512, mol_tile=8):
    """x: [n_nodes, d_model] f32, batch: [n_nodes] int32 graph ids (any order)."""
    n_nodes, d_model = x.shape
    w1, b1, w2, b2 = params
    num_classes = w2.shape[1]

    d_pad = _round_up(d_model, 128)
    c_pad = _round_up(num_classes, 128)
    # Node tile: multiple of 128 so the [1, TILE_N] batch-id block is lane-aligned.
    tile_n = _round_up(max(128, min(tile_n, _round_up(n_nodes, 128))), 128)
    n_pad = _round_up(n_nodes, tile_n)
    mol_pad = _round_up(max(int(n_molecules), 1), mol_tile)
    n_node_tiles = n_pad // tile_n
    n_mol_blocks = mol_pad // mol_tile

    # Wrapper-side padding to lane/sublane-friendly shapes; bf16 operands for the
    # large matmuls (halves HBM traffic for x), f32 accumulation inside the kernel.
    x_p = jnp.zeros((n_pad, d_pad), jnp.bfloat16).at[:n_nodes, :d_model].set(
        x.astype(jnp.bfloat16))
    batch_p = jnp.full((1, n_pad), -1, jnp.int32).at[0, :n_nodes].set(
        batch.astype(jnp.int32))
    w1_p = jnp.zeros((d_pad, d_pad), jnp.bfloat16).at[:d_model, :d_model].set(
        w1.astype(jnp.bfloat16))
    b1_p = jnp.zeros((1, d_pad), jnp.float32).at[0, :d_model].set(b1.astype(jnp.float32))
    w2_p = jnp.zeros((d_pad, c_pad), jnp.float32).at[:d_model, :num_classes].set(
        w2.astype(jnp.float32))
    b2_p = jnp.zeros((1, c_pad), jnp.float32).at[0, :num_classes].set(
        b2.astype(jnp.float32))

    flops = (2 * n_pad * d_pad * d_pad                 # layer-1 matmul
             + 2 * mol_pad * n_pad * d_pad             # one-hot pooling matmul
             + 2 * mol_pad * d_pad * c_pad)            # final projection
    bytes_accessed = (x_p.size * 2 + batch_p.size * 4 + w1_p.size * 2
                      + b1_p.size * 4 + w2_p.size * 4 + b2_p.size * 4
                      + mol_pad * c_pad * 4)

    # VMEM budget: double-buffered streamed inputs + resident weights/accumulators.
    # Raise the scoped limit above v5e's 16 MiB default but stay well under v7x's
    # 64 MiB physical VMEM.
    vmem_bytes = (2 * (tile_n * d_pad * 2 + tile_n * 4)
                  + 2 * (d_pad * d_pad * 2 + d_pad * 4 + d_pad * c_pad * 4 + c_pad * 4)
                  + mol_tile * d_pad * 4 + mol_tile * 4
                  + 2 * mol_tile * c_pad * 4)
    vmem_limit = int(min(max(2 * vmem_bytes, 32 * 1024 * 1024), 48 * 1024 * 1024))

    out_padded = pl.pallas_call(
        functools.partial(_head_kernel, mol_tile=mol_tile),
        out_shape=jax.ShapeDtypeStruct((mol_pad, c_pad), jnp.float32),
        grid_spec=pltpu.PrefetchScalarGridSpec(
            num_scalar_prefetch=0,
            grid=(n_mol_blocks, n_node_tiles),
            in_specs=[
                pl.BlockSpec((1, tile_n), lambda m, i: (0, i)),       # batch ids
                pl.BlockSpec((tile_n, d_pad), lambda m, i: (i, 0)),   # node features
                pl.BlockSpec((d_pad, d_pad), lambda m, i: (0, 0)),    # w1
                pl.BlockSpec((1, d_pad), lambda m, i: (0, 0)),        # b1
                pl.BlockSpec((d_pad, c_pad), lambda m, i: (0, 0)),    # w2
                pl.BlockSpec((1, c_pad), lambda m, i: (0, 0)),        # b2
            ],
            out_specs=pl.BlockSpec((mol_tile, c_pad), lambda m, i: (m, 0)),
            scratch_shapes=[
                pltpu.VMEM((mol_tile, d_pad), jnp.float32),           # pooled accumulator
                pltpu.VMEM((mol_tile, 1), jnp.float32),               # per-graph node counts
            ],
        ),
        compiler_params=pltpu.CompilerParams(
            dimension_semantics=("parallel", "arbitrary"),
            vmem_limit_bytes=vmem_limit,
        ),
        cost_estimate=pl.CostEstimate(
            flops=flops,
            transcendentals=n_pad * d_pad,
            bytes_accessed=bytes_accessed,
        ),
    )(batch_p, x_p, w1_p, b1_p, w2_p, b2_p)

    return out_padded[:n_molecules, :num_classes]


def _reference(x, batch, n_molecules, params):
    w1, b1, w2, b2 = params
    h = x @ w1 + b1
    h = h * jax.nn.sigmoid(h)
    logits = h @ w2 + b2
    out = jnp.zeros((n_molecules, logits.shape[1]), jnp.float32)
    return out.at[batch].add(logits)


if __name__ == "__main__":
    # Small shapes consistent with the module's forward.
    n_molecules = 3
    nodes_per_graph = 100
    n_nodes = n_molecules * nodes_per_graph   # total nodes across the batch
    d_model = 32                              # d_model_node
    num_classes = 8                           # target_config.num_classes

    key = jax.random.PRNGKey(0)
    kx, kw1, kb1, kw2, kb2 = jax.random.split(key, 5)

    x = jax.random.normal(kx, (n_nodes, d_model), dtype=jnp.float32)
    # data.batch: graph assignment per node (sorted, as in PyG batching)
    batch = jnp.repeat(jnp.arange(n_molecules, dtype=jnp.int32), nodes_per_graph)

    # Deterministic parameter init (synthetic; no checkpoint loading).
    w1 = jax.random.normal(kw1, (d_model, d_model), dtype=jnp.float32) * 0.05
    b1 = jax.random.normal(kb1, (d_model,), dtype=jnp.float32) * 0.01
    w2 = jax.random.normal(kw2, (d_model, num_classes), dtype=jnp.float32) * 0.05
    b2 = jax.random.normal(kb2, (num_classes,), dtype=jnp.float32) * 0.01
    params = (w1, b1, w2, b2)

    # TODO(synk): dropout (target_config.dropout) omitted — it is None in this
    # config and identity at inference time anyway.

    # tile_n=128 -> 3 node tiles: exercises the tiled accumulate/finalize path.
    out = graph_multiclass_head(x, batch, n_molecules, params, tile_n=128)
    out = jax.block_until_ready(out)

    ref = _reference(x, batch, n_molecules, params)
    assert out.shape == (n_molecules, num_classes)
    # bf16 matmul operands with f32 accumulation -> compare with bf16-level tolerance.
    assert jnp.allclose(out, ref, atol=1e-2, rtol=1e-2), "mismatch vs reference"

    print("KERNEL_OK")
</pallas_src>

<mosaic_0001>
module attributes {stable_mosaic.version = 11 : i64} {
  func.func @_head_kernel(%arg0: i32, %arg1: i32, %arg2: memref<1x128xi32, #tpu.memory_space<vmem>>, %arg3: memref<128x128xbf16, #tpu.memory_space<vmem>>, %arg4: memref<128x128xbf16, #tpu.memory_space<vmem>>, %arg5: memref<1x128xf32, #tpu.memory_space<vmem>>, %arg6: memref<128x128xf32, #tpu.memory_space<vmem>>, %arg7: memref<1x128xf32, #tpu.memory_space<vmem>>, %arg8: memref<8x128xf32, #tpu.memory_space<vmem>>, %arg9: memref<8x128xf32, #tpu.memory_space<vmem>>, %arg10: memref<8x1xf32, #tpu.memory_space<vmem>>) attributes {dimension_semantics = [#tpu.dimension_semantics<parallel>, #tpu.dimension_semantics<arbitrary>], iteration_bounds = array<i64: 1, 3>, scalar_prefetch = 0 : i64, scratch_operands = 2 : i64, tpu.core_type = #tpu.core_type<tc>, window_params = [{transform_indices = @transform_0, window_bounds = array<i64: 1, 128>}, {transform_indices = @transform_1, window_bounds = array<i64: 128, 128>}, {pipeline_mode = #tpu.pipeline_mode<synchronous>, transform_indices = @transform_2, window_bounds = array<i64: 128, 128>}, {pipeline_mode = #tpu.pipeline_mode<synchronous>, transform_indices = @transform_3, window_bounds = array<i64: 1, 128>}, {pipeline_mode = #tpu.pipeline_mode<synchronous>, transform_indices = @transform_4, window_bounds = array<i64: 128, 128>}, {pipeline_mode = #tpu.pipeline_mode<synchronous>, transform_indices = @transform_5, window_bounds = array<i64: 1, 128>}, {transform_indices = @transform_6, window_bounds = array<i64: 8, 128>}]} {
    %c0_i32 = arith.constant 0 : i32
    %0 = arith.cmpi eq, %arg1, %c0_i32 : i32
    %1 = arith.extui %0 : i1 to i32
    %c0_i32_0 = arith.constant 0 : i32
    %2 = arith.cmpi ne, %1, %c0_i32_0 : i32
    scf.if %2 {
      %cst_20 = arith.constant 0.000000e+00 : f32
      %40 = vector.broadcast %cst_20 : f32 to vector<8x128xf32>
      %c0_21 = arith.constant 0 : index
      %c0_22 = arith.constant 0 : index
      %41 = vector.load %arg9[%c0_21, %c0_22] : memref<8x128xf32, #tpu.memory_space<vmem>>, vector<8x128xf32>
      tpu.vector_store %arg9[%c0_21, %c0_22], %40 {strides = array<i32>} : memref<8x128xf32, #tpu.memory_space<vmem>>, vector<8x128xf32>,
      %cst_23 = arith.constant 0.000000e+00 : f32
      %42 = vector.broadcast %cst_23 : f32 to vector<8x1xf32>
      %c0_24 = arith.constant 0 : index
      %c0_25 = arith.constant 0 : index
      %43 = vector.load %arg10[%c0_24, %c0_25] : memref<8x1xf32, #tpu.memory_space<vmem>>, vector<8x1xf32>
      tpu.vector_store %arg10[%c0_24, %c0_25], %42 {strides = array<i32>} : memref<8x1xf32, #tpu.memory_space<vmem>>, vector<8x1xf32>,
    } else {
    }
    %c0 = arith.constant 0 : index
    %c0_1 = arith.constant 0 : index
    %3 = vector.load %arg3[%c0, %c0_1] : memref<128x128xbf16, #tpu.memory_space<vmem>>, vector<128x128xbf16>
    %c0_2 = arith.constant 0 : index
    %c0_3 = arith.constant 0 : index
    %4 = vector.load %arg4[%c0_2, %c0_3] : memref<128x128xbf16, #tpu.memory_space<vmem>>, vector<128x128xbf16>
    %cst = arith.constant dense<0.000000e+00> : vector<128x128xf32>
    %5 = tpu.matmul %3, %4, %cst {dimension_numbers = #tpu.dot_dimension_numbers<[1], [0], [0], [1], [0, 0, 1, 1], [], []>} : vector<128x128xbf16>, vector<128x128xbf16>, vector<128x128xf32> -> vector<128x128xf32>
    %c0_4 = arith.constant 0 : index
    %c0_5 = arith.constant 0 : index
    %6 = vector.load %arg5[%c0_4, %c0_5] : memref<1x128xf32, #tpu.memory_space<vmem>>, vector<1x128xf32>
    %7 = vector.broadcast %6 : vector<1x128xf32> to vector<128x128xf32>
    %8 = arith.addf %5, %7 : vector<128x128xf32>
    %9 = arith.negf %8 : vector<128x128xf32>
    %10 = math.exp %9 : vector<128x128xf32>
    %cst_6 = arith.constant 1.000000e+00 : f32
    %11 = vector.broadcast %cst_6 : f32 to vector<128x128xf32>
    %12 = arith.addf %11, %10 : vector<128x128xf32>
    %13 = arith.divf %11, %12 : vector<128x128xf32>
    %14 = arith.mulf %8, %13 : vector<128x128xf32>
    %c0_7 = arith.constant 0 : index
    %c0_8 = arith.constant 0 : index
    %15 = vector.load %arg2[%c0_7, %c0_8] : memref<1x128xi32, #tpu.memory_space<vmem>>, vector<1x128xi32>
    %16 = tpu.iota {dimensions = array<i32: 0>} : vector<8x128xi32>
    %c8_i32 = arith.constant 8 : i32
    %17 = arith.muli %arg0, %c8_i32 : i32
    %18 = vector.broadcast %17 : i32 to vector<8x128xi32>
    %19 = arith.addi %16, %18 : vector<8x128xi32>
    %20 = vector.broadcast %15 : vector<1x128xi32> to vector<8x128xi32>
    %21 = arith.cmpi eq, %19, %20 : vector<8x128xi32>
    %22 = arith.extui %21 : vector<8x128xi1> to vector<8x128xi32>
    %23 = arith.sitofp %22 : vector<8x128xi32> to vector<8x128xf32>
    %24 = arith.truncf %23 : vector<8x128xf32> to vector<8x128xbf16>
    %c0_9 = arith.constant 0 : index
    %c0_10 = arith.constant 0 : index
    %25 = vector.load %arg9[%c0_9, %c0_10] : memref<8x128xf32, #tpu.memory_space<vmem>>, vector<8x128xf32>
    %26 = arith.truncf %14 : vector<128x128xf32> to vector<128x128xbf16>
    %cst_11 = arith.constant dense<0.000000e+00> : vector<8x128xf32>
    %27 = tpu.matmul %24, %26, %cst_11 {dimension_numbers = #tpu.dot_dimension_numbers<[1], [0], [0], [1], [0, 0, 1, 1], [], []>} : vector<8x128xbf16>, vector<128x128xbf16>, vector<8x128xf32> -> vector<8x128xf32>
    %28 = arith.addf %25, %27 : vector<8x128xf32>
    %c0_12 = arith.constant 0 : index
    %c0_13 = arith.constant 0 : index
    %29 = vector.load %arg9[%c0_12, %c0_13] : memref<8x128xf32, #tpu.memory_space<vmem>>, vector<8x128xf32>
    tpu.vector_store %arg9[%c0_12, %c0_13], %28 {strides = array<i32>} : memref<8x128xf32, #tpu.memory_space<vmem>>, vector<8x128xf32>,
    %c0_14 = arith.constant 0 : index
    %c0_15 = arith.constant 0 : index
    %30 = vector.load %arg10[%c0_14, %c0_15] : memref<8x1xf32, #tpu.memory_space<vmem>>, vector<8x1xf32>
    %31 = arith.extui %21 : vector<8x128xi1> to vector<8x128xi32>
    %32 = arith.sitofp %31 : vector<8x128xi32> to vector<8x128xf32>
    %cst_16 = arith.constant dense<0.000000e+00> : vector<8xf32>
    %33 = vector.multi_reduction <add>, %32, %cst_16 [1] : vector<8x128xf32> to vector<8xf32>
    %34 = vector.shape_cast %33 : vector<8xf32> to vector<8x1xf32>
    %35 = arith.addf %30, %34 : vector<8x1xf32>
    %c0_17 = arith.constant 0 : index
    %c0_18 = arith.constant 0 : index
    %36 = vector.load %arg10[%c0_17, %c0_18] : memref<8x1xf32, #tpu.memory_space<vmem>>, vector<8x1xf32>
    tpu.vector_store %arg10[%c0_17, %c0_18], %35 {strides = array<i32>} : memref<8x1xf32, #tpu.memory_space<vmem>>, vector<8x1xf32>,
    %c2_i32 = arith.constant 2 : i32
    %37 = arith.cmpi eq, %arg1, %c2_i32 : i32
    %38 = arith.extui %37 : i1 to i32
    %c0_i32_19 = arith.constant 0 : i32
    %39 = arith.cmpi ne, %38, %c0_i32_19 : i32
    scf.if %39 {
      %c0_20 = arith.constant 0 : index
      %c0_21 = arith.constant 0 : index
      %40 = vector.load %arg9[%c0_20, %c0_21] : memref<8x128xf32, #tpu.memory_space<vmem>>, vector<8x128xf32>
      %c0_22 = arith.constant 0 : index
      %c0_23 = arith.constant 0 : index
      %41 = vector.load %arg6[%c0_22, %c0_23] : memref<128x128xf32, #tpu.memory_space<vmem>>, vector<128x128xf32>
      %cst_24 = arith.constant dense<0.000000e+00> : vector<8x128xf32>
      %42 = tpu.matmul %40, %41, %cst_24 {dimension_numbers = #tpu.dot_dimension_numbers<[1], [0], [0], [1], [0, 0, 1, 1], [], []>} : vector<8x128xf32>, vector<128x128xf32>, vector<8x128xf32> -> vector<8x128xf32>
      %c0_25 = arith.constant 0 : index
      %c0_26 = arith.constant 0 : index
      %43 = vector.load %arg10[%c0_25, %c0_26] : memref<8x1xf32, #tpu.memory_space<vmem>>, vector<8x1xf32>
      %c0_27 = arith.constant 0 : index
      %c0_28 = arith.constant 0 : index
      %44 = vector.load %arg7[%c0_27, %c0_28] : memref<1x128xf32, #tpu.memory_space<vmem>>, vector<1x128xf32>
      %45 = vector.broadcast %43 : vector<8x1xf32> to vector<8x128xf32>
      %46 = vector.broadcast %44 : vector<1x128xf32> to vector<8x128xf32>
      %47 = arith.mulf %45, %46 : vector<8x128xf32>
      %48 = arith.addf %42, %47 : vector<8x128xf32>
      %c0_29 = arith.constant 0 : index
      %c0_30 = arith.constant 0 : index
      %49 = vector.load %arg8[%c0_29, %c0_30] : memref<8x128xf32, #tpu.memory_space<vmem>>, vector<8x128xf32>
      tpu.vector_store %arg8[%c0_29, %c0_30], %48 {strides = array<i32>} : memref<8x128xf32, #tpu.memory_space<vmem>>, vector<8x128xf32>,
    } else {
    }
    return
  }
  func.func @transform_0(%arg0: i32, %arg1: i32) -> (i32, i32) {
    %c0_i32 = arith.constant 0 : i32
    %c0_i32_0 = arith.constant 0 : i32
    return %c0_i32, %arg1 : i32, i32
  }
  func.func @transform_1(%arg0: i32, %arg1: i32) -> (i32, i32) {
    %c0_i32 = arith.constant 0 : i32
    %c0_i32_0 = arith.constant 0 : i32
    return %arg1, %c0_i32 : i32, i32
  }
  func.func @transform_2(%arg0: i32, %arg1: i32) -> (i32, i32) {
    %c0_i32 = arith.constant 0 : i32
    %c0_i32_0 = arith.constant 0 : i32
    %c0_i32_1 = arith.constant 0 : i32
    return %c0_i32, %c0_i32_0 : i32, i32
  }
  func.func @transform_3(%arg0: i32, %arg1: i32) -> (i32, i32) {
    %c0_i32 = arith.constant 0 : i32
    %c0_i32_0 = arith.constant 0 : i32
    %c0_i32_1 = arith.constant 0 : i32
    return %c0_i32, %c0_i32_0 : i32, i32
  }
  func.func @transform_4(%arg0: i32, %arg1: i32) -> (i32, i32) {
    %c0_i32 = arith.constant 0 : i32
    %c0_i32_0 = arith.constant 0 : i32
    %c0_i32_1 = arith.constant 0 : i32
    return %c0_i32, %c0_i32_0 : i32, i32
  }
  func.func @transform_5(%arg0: i32, %arg1: i32) -> (i32, i32) {
    %c0_i32 = arith.constant 0 : i32
    %c0_i32_0 = arith.constant 0 : i32
    %c0_i32_1 = arith.constant 0 : i32
    return %c0_i32, %c0_i32_0 : i32, i32
  }
  func.func @transform_6(%arg0: i32, %arg1: i32) -> (i32, i32) {
    %c0_i32 = arith.constant 0 : i32
    %c0_i32_0 = arith.constant 0 : i32
    return %arg0, %c0_i32 : i32, i32
  }
}

</mosaic_0001>

<bundles_post_ra>
// kernel: tpu_custom_call.1
= control target key start
LH: loop header
LB: loop body
LE: loop exit
PB: predicated region body
PF: predicated region fallthrough
CT: control target
= control target key end

     0   :  { %s2316_s0 = inlined_call_operand.hbm [shape: s32[1,384], index: 0, kind: input, shape index: {}]   ;;  %s2317_s1 = inlined_call_operand.hbm [shape: bf16[384,128], index: 1, kind: input, shape index: {}]   ;;  %s2318_s2 = inlined_call_operand.hbm [shape: bf16[128,128], index: 2, kind: input, shape index: {}]   ;;  %s2319_s3 = inlined_call_operand.vmem [shape: f32[1,128], index: 3, kind: input, shape index: {}]   ;;  %s2320_s4 = inlined_call_operand.hbm [shape: f32[128,128], index: 4, kind: input, shape index: {}]   ;;  %s2321_s5 = inlined_call_operand.vmem [shape: f32[1,128], index: 5, kind: input, shape index: {}]   ;;  %s2322_s6 = inlined_call_operand.hbm [shape: f32[8,128], index: 6, kind: output, shape index: {}]  }
   0x1   :  { %2331 = sst [smem:[#allocation24_spill]] %s2316_s0 }
   0x2   :  { %2332 = sst [smem:[#allocation25_spill]] %s2318_s2 }
   0x3   :  { %2333 = sst [smem:[#allocation26_spill]] %s2320_s4 }
   0x4   :  { %11 = vsyncpa [#allocation5], 0 }
   0x5   :  { %13 = vsyncpa [#allocation5 + $0x1], 0 }
   0x6   :  { %14 = vsyncpa [#allocation8], 0 }
   0x7   :  { %16 = vsyncpa [#allocation8 + $0x1], 0 }
   0x8   :  { %17 = vsyncpa [#allocation11], 0 }
   0x9   :  { %18 = vsyncpa [#allocation6], 0  ;;  %s1618_s21 = smov 0   ;;  %s1620_s22 = smov 0  }
   0xa   :  { %s1622_s23 = smov 0   ;;  %s1624_s24 = smov 0  }
   0xb   :  { %s1626_s25 = smov 0   ;;  %s1628_s26 = smov 0  }
   0xc LB: > { %s1649_s27 = sadd.s32 4294967295, %s1570_s26   ;;  %p1059_p0 = scmp.ge.s32.totalorder %s1570_s26, 1  ;;  %s1570_s26 = sphi %s1628_s26, %s24_s26   ;;  %s1566_s25 = sphi %s1626_s25, %s2415_s25   ;;  %s1562_s24 = sphi %s1624_s24, %s2414_s24   ;;  %s1558_s23 = sphi %s1622_s23, %s2413_s23   ;;  %s1554_s22 = sphi %s1620_s22, %s2412_s22   ;;  %s1550_s21 = sphi %s1618_s21, %s2411_s21  }
   0xd   : > { %p57_p1 = scmp.eq.s32.totalorder %s1649_s27, 0  ;;  %p203_p2 = scmp.lt.s32.totalorder %s1570_s26, 4 }
   0xe   : > { %s2334_s2 = sld [smem:[#allocation25_spill]]  ;;  %s1572_s8 = smov [#allocation9]  }
   0xf   : > { %p1657_p3 = pnand %p1059_p0, %p203_p2  ;;  %s216_s9 = sshll.u32 %s1572_s8, 4  ;;  %s217_s9 = int_to_ptr.vmem [resolvable:$true] %s216_s9 }
  0x10   : > { %s2336_s4 = sld [smem:[#allocation26_spill]]  ;;  %s2323_s13 = smov 64  }
  0x11   : > { %p1208_p4 = pneg %p1657_p3  ;;  %s2324_s14 = smov 4  }
  0x12   : > { %s1575_s15 = smov [#allocation10]   ;;  %s1576_s17 = smov 128  }
  0x13   : > { %p1209_p5 = pnand %p1208_p4, %p57_p1  ;;  %s233_s16 = sshll.u32 %s1575_s15, 4  ;;  %s234_s16 = int_to_ptr.vmem [resolvable:$true] %s233_s16 }
  0x14   : > { %s214_s30 = sshll.u32 %s2334_s2, 4  ;;  %s1577_s18 = smov 8   ;;  %s215_s30 = int_to_ptr.hbm [resolvable:$true] %s214_s30 }
  0x15   : > { %1211 = dma.hbm_to_vmem [thread:$0]  (!%p1209_p5), %s215_s30, 1024, %s217_s9, [#allocation8], %s2323_s13, %s2323_s13, %s2324_s14  }
  0x16   : > { %s231_s12 = sshll.u32 %s2336_s4, 4  ;;  %s33_s19 = sadd.s32 1, %s1566_s25  ;;  %s232_s12 = int_to_ptr.hbm [resolvable:$true] %s231_s12 }
  0x17   : > { %1214 = dma.hbm_to_vmem [thread:$0]  (!%p1209_p5), %s232_s12, 2048, %s234_s16, [#allocation11], %s1576_s17, %s1576_s17, %s1577_s18  }
  0x18   : > { %s43_s20 = sadd.s32 1, %s1558_s23  ;;  %p34_p6 = scmp.ge.s32.totalorder %s33_s19, 3 }
  0x19   : > { %p50_p7 = scmp.ne.s32.totalorder %s1558_s23, %s1554_s22  ;;  %p51_p8 = scmp.eq.s32.totalorder %s1570_s26, 0 }
  0x1a   : > { %p56_p9 = scmp.ne.s32.totalorder %s1554_s22, %s1550_s21  ;;  %s2417_s19 = smov (%p34_p6, %s33_s19), 0 }
  0x1b   : > { %p1680_p10 = por %p51_p8, %p50_p7  ;;  %s40_s30 = ssub.s32 %s1566_s25, %s2417_s19 }
  0x1c   : > { %p1686_p11 = por %p57_p1, %p56_p9  ;;  %p1224_p12 = scmp.lt.s32.totalorder %s1570_s26, 3 }
  0x1d   : > { %p41_p13 = scmp.eq.s32.totalorder %s40_s30, 0  ;;  %s250_s8 = sand.u32 1, %s1558_s23  }
  0x1e   : > { %s2339_s0 = sld [smem:[#allocation24_spill]]  ;;  %s253_s12 = scalar_lea.vmem [#allocation4], %s250_s8 }
  0x1f   : > { %s1695_s21 = scalar_select %p41_p13, %s1558_s23, %s43_s20  }
  0x20   : > { %s260_s15 = sshll.u32 %s253_s12, 4  ;;  %p1216_p0 = pnand %p1224_p12, %p1680_p10  ;;  %s261_s15 = int_to_ptr.vmem [resolvable:$true] %s260_s15 }
  0x21   : > { %s1063_s17 = sshll.u32 %s250_s8, 6  ;;  %s1159_s18 = sshll.u32 %s1566_s25, 6 }
  0x22   : > { %s251_s13 = scalar_lea.sflag [#allocation5], %s250_s8  ;;  %s271_s30 = scalar_lea.vmem [#allocation7], %s1063_s17 }
  0x23   : > { %s279_s14 = sshll.u32 %s271_s30, 4  ;;  %s267_s2 = sand.u32 1, %s1570_s26   ;;  %s280_s14 = int_to_ptr.vmem [resolvable:$true] %s279_s14 }
  0x24   : > { %s256_s11 = scalar_lea.hbm %s2339_s0, %s1566_s25  ;;  %s276_s9 = scalar_lea.hbm %s2317_s1, %s1159_s18 }
  0x25   : > { %s258_s16 = sshll.u32 %s256_s11, 4  ;;  %s277_s10 = sshll.u32 %s276_s9, 4  ;;  %s259_s16 = int_to_ptr.hbm [resolvable:$true] %s258_s16  ;;  %s278_s10 = int_to_ptr.hbm [resolvable:$true] %s277_s10 }
  0x26   : > { %1218 = dma.hbm_to_vmem [thread:$0]  (!%p1216_p0), %s259_s16, 16, %s261_s15, %s251_s13  }
  0x27   : > { %s268_s12 = scalar_lea.sflag [#allocation8], %s267_s2  ;;  %s2340_s11 = smov 4  }
  0x28   : > { %s2341_s0 = smov 64   ;;  %291 = sbr.rel (%p1657_p3) target bundleno = 639 (0x27f), region = 44 }
  0x29   : > { %1221 = dma.hbm_to_vmem [thread:$0]  (!%p1216_p0), %s278_s10, 1024, %s280_s14, %s268_s12, %s2341_s0, %s2341_s0, %s2340_s11  }
  0x2d   : > { %s1714_s13 = sand.u32 1, %s1554_s22  }
  0x2e   : > { %s294_s28 = scalar_lea.sflag [#allocation5], %s1714_s13  ;;  %s296_s8 = scalar_lea.vmem [#allocation4], %s1714_s13 }
  0x2f   : > { %1529 = dma.done.wait (%p1686_p11), %s294_s28, 16  }
  0x30   : > { %1531 = vsyncadd (%p1686_p11), %s294_s28, 4294967280  ;;  %s302_s0 = sand.u32 1, %s1649_s27   ;;  %s1067_s2 = sshll.u32 %s1714_s13, 6 }
  0x31   : > { %s303_s4 = scalar_lea.sflag [#allocation8], %s302_s0  ;;  %s1724_s7 = scalar_lea.vmem [#allocation7], %s1067_s2 }
  0x32   : > { %1533 = dma.done.wait (%p1686_p11), %s303_s4, 1024  }
  0x33   : > { %1535 = vsyncadd (%p1686_p11), %s303_s4, 4294966272 }
  0x34   : > { %1537 = dma.done.wait (%p57_p1), [#allocation8], 1024  }
  0x35   : > { %1539 = vsyncadd (%p57_p1), [#allocation8], 4294966272 }
  0x36   : > { %1541 = dma.done.wait (%p57_p1), [#allocation11], 2048  }
  0x37   : > { %1543 = vsyncadd (%p57_p1), [#allocation11], 4294965248  ;;  %p1070_p2 = scmp.ne.s32.totalorder %s1562_s24, 0 }
  0x39   : > { %349 = sbr.rel (%p1070_p2) target bundleno = 65 (0x41), region = 64 }
  0x3e   : > { %vm351_vm0 = vcmask 7168   ;;  %v1578_v0 = vmov 0.0  }
  0x3f   : > { %350 = vst [vmem:[#allocation2] sm:$0xff] %v1578_v0 }
  0x40   : > { %352 = vst.msk [vmem:[#allocation3] sm:$0xff] %vm351_vm0, %v1578_v0 }
  0x41 PF: > { %v1175_v1 = vld [vmem:[#allocation9 + $0x38] sm:$0xff]  ;;  %v1174_v2 = vld [vmem:[#allocation9 + $0x30] sm:$0xff]  ;;  %v1173_v3 = vld [vmem:[#allocation9 + $0x28] sm:$0xff]  ;;  %p1154_p1 = scmp.ne.s32.totalorder %s1562_s24, 2 }
  0x42   : > { %1176 = vmatpush.bf16.msra.mxu2 %v1175_v1  ;;  %1177 = vmatpush.bf16.msra.mxu3 %v1175_v1  ;;  %v1172_v4 = vld [vmem:[#allocation9 + $0x20] sm:$0xff]  ;;  %v1171_v5 = vld [vmem:[#allocation9 + $0x18] sm:$0xff]  ;;  %v1170_v6 = vld [vmem:[#allocation9 + $0x10] sm:$0xff] }
  0x43   : > { %485 = vmatpush.bf16.msra.mxu0 %v1175_v1  ;;  %v1169_v7 = vld [vmem:[#allocation9 + $0x8] sm:$0xff]  ;;  %v1168_v8 = vld [vmem:[#allocation9] sm:$0xff]  ;;  %v1162_v9 = vld [vmem:[%s1724_s7 + $0x10] sm:$0xff] }
  0x44   : > { %v1165_v10 = vld [vmem:[%s1724_s7 + $0x28] sm:$0xff]  ;;  %v1160_v11 = vld [vmem:[%s1724_s7] sm:$0xff]  ;;  %v1163_v12 = vld [vmem:[%s1724_s7 + $0x18] sm:$0xff] }
  0x45   : > { %v1166_v13 = vld [vmem:[%s1724_s7 + $0x30] sm:$0xff]  ;;  %v1161_v14 = vld [vmem:[%s1724_s7 + $0x8] sm:$0xff]  ;;  %v1164_v15 = vld [vmem:[%s1724_s7 + $0x20] sm:$0xff] }
  0x46   : > { %1178 = vmatpush.bf16.msra.mxu2 %v1174_v2  ;;  %1179 = vmatpush.bf16.msra.mxu3 %v1174_v2  ;;  %v1167_v16 = vld [vmem:[%s1724_s7 + $0x38] sm:$0xff]  ;;  %v1750_v21 = vld [vmem:[%s2319_s3] ss:$0 sm:$0xff] }
  0x47   : > { %486 = vmatpush.bf16.msra.mxu0 %v1174_v2 }
  0x4a   : > { %1180 = vmatpush.bf16.msra.mxu2 %v1173_v3  ;;  %1181 = vmatpush.bf16.msra.mxu3 %v1173_v3 }
  0x4b   : > { %487 = vmatpush.bf16.msra.mxu0 %v1173_v3 }
  0x4e   : > { %1182 = vmatpush.bf16.msra.mxu2 %v1172_v4  ;;  %1183 = vmatpush.bf16.msra.mxu3 %v1172_v4 }
  0x4f   : > { %488 = vmatpush.bf16.msra.mxu0 %v1172_v4 }
  0x52   : > { %1184 = vmatpush.bf16.msra.mxu2 %v1171_v5  ;;  %1185 = vmatpush.bf16.msra.mxu3 %v1171_v5 }
  0x53   : > { %489 = vmatpush.bf16.msra.mxu0 %v1171_v5 }
  0x56   : > { %1186 = vmatpush.bf16.msra.mxu2 %v1170_v6  ;;  %1187 = vmatpush.bf16.msra.mxu3 %v1170_v6 }
  0x57   : > { %490 = vmatpush.bf16.msra.mxu0 %v1170_v6 }
  0x5a   : > { %1188 = vmatpush.bf16.msra.mxu2 %v1169_v7  ;;  %1189 = vmatpush.bf16.msra.mxu3 %v1169_v7 }
  0x5b   : > { %491 = vmatpush.bf16.msra.mxu0 %v1169_v7 }
  0x5e   : > { %1190 = vmatpush.bf16.msra.mxu2 %v1168_v8  ;;  %1191 = vmatpush.bf16.msra.mxu3 %v1168_v8 }
  0x5f   : > { %492 = vmatpush.bf16.msra.mxu0 %v1168_v8 }
  0x61   : > { %503 = vmatmul.bf16.vlgmr.msra.gmra.mxu2 %v1162_v9  ;;  %518 = vmatmul.bf16.vlgmr.msra.gmra.mxu3 %v1165_v10 }
  0x62   : > { %493 = vmatmul.bf16.vlgmr.msra.gmra.mxu0 %v1160_v11 }
  0x71   : > { %508 = vmatmul.bf16.gmra.mxu2 %v1163_v12  ;;  %523 = vmatmul.bf16.gmra.mxu3 %v1166_v13 }
  0x72   : > { %498 = vmatmul.bf16.gmra.mxu0 %v1161_v14 }
  0x81   : > { %513 = vmatmul.bf16.gmra.mxu2 %v1164_v15  ;;  %528 = vmatmul.bf16.gmra.mxu3 %v1167_v16 }
  0xdf   : > { %v494_v22 = vpop.f32.mrf.mxu0 }
  0xe0   : > { %v1753_v23 = vadd.f32 %v1750_v21, %v494_v22 }
  0xe2   : > { %2342 = vst [vmem:[#allocation18_spill] sm:$0xff] %v1753_v23  ;;  %v1135_v27 = vmul.f32 -1.442695, %v1753_v23 }
  0xe4   : > { %v504_v17 = vpop.f32.mrf.mxu2  ;;  %v519_v18 = vpop.f32.mrf.mxu3  ;;  %1290 = vpow2.f32 %v1135_v27 }
  0xe5   : > { %v1756_v25 = vadd.f32 %v1750_v21, %v519_v18  ;;  %v1759_v26 = vadd.f32 %v1750_v21, %v504_v17 }
  0xe7   : > { %2343 = vst [vmem:[#allocation19_spill] sm:$0xff] %v1759_v26  ;;  %v1145_v29 = vmul.f32 -1.442695, %v1756_v25  ;;  %v1139_v31 = vmul.f32 -1.442695, %v1759_v26  ;;  %v496_v32 = vpop.f32.mrf.mxu0 }
  0xe8   : > { %v1772_v36 = vadd.f32 %v1750_v21, %v496_v32 }
  0xe9   : > { %1292 = vpow2.f32 %v1145_v29 }
  0xea   : > { %1294 = vpow2.f32 %v1139_v31  ;;  %2344 = vst [vmem:[#allocation20_spill] sm:$0xff] %v1772_v36  ;;  %v1291_v37 = vpop.eup %1290  ;;  %v1136_v42 = vmul.f32 -1.442695, %v1772_v36 }
  0xeb   : > { %v1779_v43 = vadd.f32 1.0, %v1291_v37 }
  0xec   : > { %v506_v19 = vpop.f32.mrf.mxu2  ;;  %v521_v20 = vpop.f32.mrf.mxu3 }
  0xed   : > { %v1764_v30 = vadd.f32 %v1750_v21, %v521_v20  ;;  %v1785_v47 = vadd.f32 %v1750_v21, %v506_v19 }
  0xef   : > { %v1146_v35 = vmul.f32 -1.442695, %v1764_v30  ;;  %v1293_v41 = vpop.eup %1292  ;;  %v1140_v51 = vmul.f32 -1.442695, %v1785_v47  ;;  %v499_v55 = vpop.f32.mrf.mxu0 }
  0xf0   : > { %v1295_v44 = vpop.eup %1294  ;;  %v1782_v46 = vadd.f32 1.0, %v1293_v41  ;;  %v1796_v57 = vadd.f32 %v1750_v21, %v499_v55 }
  0xf1   : > { %1296 = vpow2.f32 %v1146_v35  ;;  %v1787_v50 = vadd.f32 1.0, %v1295_v44 }
  0xf2   : > { %2345 = vst [vmem:[#allocation21_spill] sm:$0xff] %v1796_v57  ;;  %v1137_v3 = vmul.f32 -1.442695, %v1796_v57  ;;  %v757_v37 = vand.u32 2147483647, %v1782_v46  ;;  %vm753_vm1 = vweird.f32 %v1782_v46 }
  0xf3   : > { %v669_v17 = vand.u32 2147483648, %v1787_v50 }
  0xf4   : > { %v509_v24 = vpop.f32.mrf.mxu2  ;;  %v524_v28 = vpop.f32.mrf.mxu3  ;;  %vm1877_vm2 = vcmp.eq.f32.partialorder %v757_v37, 8.507059e+37 }
  0xf5   : > { %v1768_v34 = vadd.f32 %v1750_v21, %v524_v28  ;;  %v1775_v38 = vadd.f32 %v1750_v21, %v509_v24 }
  0xf7   : > { %v1147_v39 = vmul.f32 -1.442695, %v1768_v34  ;;  %v1141_v45 = vmul.f32 -1.442695, %v1775_v38  ;;  %v1297_v49 = vpop.eup %1296  ;;  %v501_v31 = vpop.f32.mrf.mxu0 }
  0xf8   : > { %v1792_v53 = vadd.f32 1.0, %v1297_v49 }
  0xf9   : > { %1298 = vpow2.f32 %v1147_v39  ;;  %v759_v39 = vand.u32 2147483648, %v1782_v46 }
  0xfa   : > { %1300 = vpow2.f32 %v1136_v42  ;;  %vm768_vm6 = vweird.f32 %v1792_v53 }
  0xfb   : > { %1302 = vrcp.f32 %v1779_v43 }
  0xfc   : > { %v511_v33 = vpop.f32.mrf.mxu2  ;;  %v526_v40 = vpop.f32.mrf.mxu3  ;;  %1304 = vpow2.f32 %v1141_v45 }
  0xfd   : > { %1306 = vrcp.f32 %v1782_v46  ;;  %v1804_v61 = vadd.f32 %v1750_v21, %v526_v40  ;;  %v1811_v0 = vadd.f32 %v1750_v21, %v511_v33 }
  0xfe   : > { %1308 = vrcp.f32 %v1787_v50 }
  0xff   : > { %v1299_v52 = vpop.eup %1298  ;;  %1310 = vpow2.f32 %v1140_v51  ;;  %v1148_v4 = vmul.f32 -1.442695, %v1804_v61  ;;  %v1142_v13 = vmul.f32 -1.442695, %v1811_v0  ;;  %v1866_v51 = vadd.f32 %v1750_v21, %v501_v31 }
 0x100   : > { %v1301_v56 = vpop.eup %1300  ;;  %v1800_v59 = vadd.f32 1.0, %v1299_v52  ;;  %1312 = vrcp.f32 %v1792_v53  ;;  %v772_v31 = vand.u32 2147483647, %v1792_v53 }
 0x101   : > { %v1798_v58 = vpop.eup %1302  ;;  %v1808_v63 = vadd.f32 1.0, %v1301_v56  ;;  %2346 = vst [vmem:[#allocation22_spill] sm:$0xff] %v1866_v51 }
 0x102   : > { %v1305_v60 = vpop.eup %1304  ;;  %v599_v6 = vmul.f32 %v1798_v58, %v1779_v43  ;;  %1314 = vrcp.f32 %v1800_v59  ;;  %vm1932_vm7 = vcmp.eq.f32.partialorder %v772_v31, 8.507059e+37  ;;  %vm783_vm10 = vweird.f32 %v1800_v59 }
 0x103   : > { %v1806_v62 = vpop.eup %1306  ;;  %v1822_v7 = vadd.f32 1.0, %v1305_v60  ;;  %1316 = vpow2.f32 %v1148_v4 }
 0x104   : > { %v514_v48 = vpop.f32.mrf.mxu2  ;;  %v529_v54 = vpop.f32.mrf.mxu3  ;;  %v749_v9 = vmul.f32 %v1806_v62, %v1782_v46  ;;  %1318 = vrcp.f32 %v1808_v63  ;;  %v600_v22 = vsub.f32 1.0, %v599_v6  ;;  %vm754_vm3 = vweird.f32 %v1806_v62 }
 0x105   : > { %v1814_v1 = vadd.f32 %v1750_v21, %v529_v54  ;;  %v1818_v5 = vpop.eup %1308  ;;  %v1826_v8 = vadd.f32 %v1750_v21, %v514_v48  ;;  %1320 = vpow2.f32 %v1137_v3  ;;  %v1875_v3 = vor.u32 1.1754944e-38, %v669_v17  ;;  %vm1906_vm4 = vmor %vm753_vm1, %vm754_vm3 }
 0x106   : > { %v1311_v12 = vpop.eup %1310  ;;  %v659_v15 = vmul.f32 %v1818_v5, %v1787_v50  ;;  %1322 = vrcp.f32 %v1822_v7  ;;  %v750_v20 = vsub.f32 1.0, %v749_v9  ;;  %v601_v49 = vmul.f32 %v1798_v58, %v600_v22 }
 0x107   : > { %v1149_v10 = vmul.f32 -1.442695, %v1814_v1  ;;  %v1836_v14 = vpop.eup %1312  ;;  %v1143_v19 = vmul.f32 -1.442695, %v1826_v8  ;;  %v1847_v28 = vadd.f32 1.0, %v1311_v12  ;;  %v699_v9 = vand.u32 2147483648, %v1822_v7 }
 0x108   : > { %v1845_v27 = vpop.eup %1314  ;;  %v764_v29 = vmul.f32 %v1836_v14, %v1792_v53  ;;  %v660_v35 = vsub.f32 1.0, %v659_v15  ;;  %v751_v48 = vmul.f32 %v1806_v62, %v750_v20  ;;  %v1892_v20 = vadd.f32 %v1798_v58, %v601_v49 }
 0x109   : > { %1324 = vpow2.f32 %v1149_v10  ;;  %v1317_v33 = vpop.eup %1316  ;;  %v779_v55 = vmul.f32 %v1845_v27, %v1800_v59  ;;  %vm769_vm5 = vweird.f32 %v1836_v14  ;;  %vm784_vm9 = vweird.f32 %v1845_v27 }
 0x10a   : > { %1326 = vpow2.f32 %v1142_v13  ;;  %v1856_v40 = vpop.eup %1318  ;;  %v1860_v44 = vadd.f32 1.0, %v1317_v33  ;;  %v765_v54 = vsub.f32 1.0, %v764_v29  ;;  %v752_v15 = vadd.f32 %v1806_v62, %v751_v48  ;;  %2349 = vst [vmem:[#allocation23_spill] sm:$0xff] %v1892_v20  ;;  %vm1942_vm8 = vmor %vm768_vm6, %vm769_vm5 }
 0x10b   : > { %v1321_v45 = vpop.eup %1320  ;;  %v614_v46 = vmul.f32 %v1856_v40, %v1808_v63  ;;  %vm1971_vm11 = vmor %vm783_vm10, %vm784_vm9  ;;  %v2005_v42 = vor.u32 1.1754944e-38, %v699_v9 }
 0x10c   : > { %v516_v2 = vpop.f32.mrf.mxu2  ;;  %v531_v16 = vpop.f32.mrf.mxu3  ;;  %v1883_v12 = vadd.f32 1.0, %v1321_v45  ;;  %v766_v22 = vmul.f32 %v1836_v14, %v765_v54  ;;  %v756_v49 = vsel %vm1906_vm4, %v1806_v62, %v752_v15  ;;  %vm798_vm13 = vweird.f32 %v1860_v44 }
 0x10d   : > { %v1832_v11 = vadd.f32 %v1750_v21, %v516_v2  ;;  %v1852_v32 = vadd.f32 %v1750_v21, %v531_v16  ;;  %v1868_v52 = vpop.eup %1322  ;;  %v661_v2 = vmul.f32 %v1818_v5, %v660_v35  ;;  %v760_v21 = vor.u32 1.1754944e-38, %v759_v39 }
 0x10e   : > { %v1138_v16 = vmul.f32 -1.442695, %v1866_v51  ;;  %v774_v39 = vand.u32 2147483648, %v1792_v53  ;;  %v689_v45 = vmul.f32 %v1868_v52, %v1822_v7  ;;  %v615_v53 = vsub.f32 1.0, %v614_v46 }
 0x10f   : > { %v1144_v24 = vmul.f32 -1.442695, %v1832_v11  ;;  %v1150_v56 = vmul.f32 -1.442695, %v1852_v32  ;;  %v1325_v60 = vpop.eup %1324  ;;  %v1896_v29 = vadd.f32 %v1818_v5, %v661_v2  ;;  %v761_v15 = vsel %vm1877_vm2, %v760_v21, %v756_v49 }
 0x110   : > { %v1327_v6 = vpop.eup %1326  ;;  %v1889_v17 = vadd.f32 1.0, %v1325_v60  ;;  %v767_v60 = vadd.f32 %v1836_v14, %v766_v22  ;;  %vm693_vm4 = vweird.f32 %v1822_v7  ;;  %vm694_vm5 = vweird.f32 %v1868_v52 }
 0x111   : > { %1328 = vpow2.f32 %v1144_v24  ;;  %v780_v24 = vsub.f32 1.0, %v779_v55  ;;  %v1899_v33 = vadd.f32 1.0, %v1327_v6 }
 0x112   : > { %1330 = vpow2.f32 %v1143_v19  ;;  %v771_v21 = vsel %vm1942_vm8, %v1836_v14, %v767_v60  ;;  %vm813_vm0 = vweird.f32 %v1889_v17 }
 0x113   : > { %1332 = vrcp.f32 %v1847_v28  ;;  %v781_v2 = vmul.f32 %v1845_v27, %v780_v24  ;;  %v787_v24 = vand.u32 2147483647, %v1800_v59 }
 0x114   : > { %1334 = vrcp.f32 %v1860_v44 }
 0x115   : > { %1336 = vpow2.f32 %v1150_v56  ;;  %v1985_v56 = vmul.f32 %v1856_v40, %v615_v53  ;;  %vm788_vm12 = vcmp.eq.f32.partialorder %v787_v24, 8.507059e+37 }
 0x116   : > { %1338 = vrcp.f32 %v1889_v17 }
 0x117   : > { %v1329_v13 = vpop.eup %1328  ;;  %1340 = vrcp.f32 %v1883_v12 }
 0x118   : > { %v1331_v19 = vpop.eup %1330  ;;  %v1914_v48 = vadd.f32 1.0, %v1329_v13  ;;  %1342 = vpow2.f32 %v1138_v16  ;;  %v775_v16 = vor.u32 1.1754944e-38, %v774_v39  ;;  %v782_v39 = vadd.f32 %v1845_v27, %v781_v2 }
 0x119   : > { %v1902_v35 = vpop.eup %1332  ;;  %v1921_v54 = vadd.f32 1.0, %v1331_v19  ;;  %1344 = vrcp.f32 %v1899_v33  ;;  %v690_v19 = vsub.f32 1.0, %v689_v45 }
 0x11a   : > { %v1923_v55 = vpop.eup %1334  ;;  %v674_v6 = vmul.f32 %v1902_v35, %v1847_v28  ;;  %1346 = vrcp.f32 %v1914_v48  ;;  %v786_v62 = vsel %vm1971_vm11, %v1845_v27, %v782_v39  ;;  %vm663_vm11 = vweird.f32 %v1787_v50 }
 0x11b   : > { %v1337_v13 = vpop.eup %1336  ;;  %v794_v31 = vmul.f32 %v1923_v55, %v1860_v44  ;;  %1348 = vrcp.f32 %v1921_v54  ;;  %v691_v10 = vmul.f32 %v1868_v52, %v690_v19  ;;  %vm799_vm15 = vweird.f32 %v1923_v55 }
 0x11c   : > { %v1940_v22 = vpop.eup %1338  ;;  %v1949_v37 = vadd.f32 1.0, %v1337_v13  ;;  %v675_v46 = vsub.f32 1.0, %v674_v6  ;;  %v789_v13 = vand.u32 2147483648, %v1800_v59  ;;  %v776_v6 = vsel %vm1932_vm7, %v775_v16, %v771_v21  ;;  %vm2047_vm6 = vmor %vm798_vm13, %vm799_vm15 }
 0x11d   : > { %v1951_v4 = vpop.eup %1340  ;;  %v809_v45 = vmul.f32 %v1940_v22, %v1889_v17  ;;  %v795_v19 = vsub.f32 1.0, %v794_v31  ;;  %v2003_v53 = vadd.f32 %v1868_v52, %v691_v10  ;;  %vm814_vm14 = vweird.f32 %v1940_v22 }
 0x11e   : > { %v1343_v49 = vpop.eup %1342  ;;  %1350 = vrcp.f32 %v1949_v37  ;;  %v1977_v18 = vmul.f32 %v1951_v4, %v1883_v12  ;;  %v1995_v2 = vmul.f32 %v1902_v35, %v675_v46  ;;  %v790_v41 = vor.u32 1.1754944e-38, %v789_v13  ;;  %vm2030_vm2 = vmor %vm813_vm0, %vm814_vm14 }
 0x11f   : > { %v810_v14 = vsub.f32 1.0, %v809_v45  ;;  %v1966_v60 = vpop.eup %1344  ;;  %v1982_v45 = vmul.f32 %v761_v15, %v1756_v25  ;;  %v1990_v16 = vadd.f32 1.0, %v1343_v49  ;;  %v2000_v15 = vmul.f32 %v776_v6, %v1764_v30 }
 0x120   : > { %v1979_v59 = vpop.eup %1346  ;;  %v2007_v27 = vsel %vm788_vm12, %v790_v41, %v786_v62  ;;  %v796_v49 = vmul.f32 %v1923_v55, %v795_v19  ;;  %v704_v30 = vmul.f32 %v1966_v60, %v1899_v33  ;;  %v802_v41 = vand.u32 2147483647, %v1860_v44 }
 0x121   : > { %v1992_v21 = vpop.eup %1348  ;;  %v811_v25 = vmul.f32 %v1940_v22, %v810_v14  ;;  %v734_v46 = vmul.f32 %v1979_v59, %v1914_v48  ;;  %1352 = vrcp.f32 %v1990_v16  ;;  %v804_v14 = vand.u32 2147483648, %v1860_v44 }
 0x122   : > { %v719_v9 = vmul.f32 %v1992_v21, %v1921_v54  ;;  %v817_v6 = vand.u32 2147483647, %v1889_v17  ;;  %v819_v19 = vand.u32 2147483648, %v1889_v17  ;;  %v797_v62 = vadd.f32 %v1923_v55, %v796_v49 }
 0x123   : > { %v812_v10 = vadd.f32 %v1940_v22, %v811_v25  ;;  %v735_v39 = vsub.f32 1.0, %v734_v46  ;;  %v705_v36 = vsub.f32 1.0, %v704_v30  ;;  %vm723_vm1 = vweird.f32 %v1921_v54 }
 0x124   : > { %v1351_v13 = vpop.eup %1350  ;;  %v720_v25 = vsub.f32 1.0, %v719_v9  ;;  %v834_v51 = vand.u32 2147483648, %v1949_v37  ;;  %v832_v49 = vand.u32 2147483647, %v1949_v37  ;;  %vm2051_vm7 = vcmp.eq.f32.partialorder %v802_v41, 8.507059e+37 }
 0x125   : > { %v824_v24 = vmul.f32 %v1351_v13, %v1949_v37  ;;  %v816_v57 = vsel %vm2030_vm2, %v1940_v22, %v812_v10  ;;  %vm829_vm3 = vweird.f32 %v1351_v13  ;;  %v727_v22 = vand.u32 2147483647, %v1921_v54 }
 0x126   : > { %vm818_vm8 = vcmp.eq.f32.partialorder %v817_v6, 8.507059e+37  ;;  %v801_v30 = vsel %vm2047_vm6, %v1923_v55, %v797_v62  ;;  %v736_v9 = vmul.f32 %v1979_v59, %v735_v39  ;;  %vm828_vm9 = vweird.f32 %v1949_v37 }
 0x127   : > { %v825_v31 = vsub.f32 1.0, %v824_v24  ;;  %v2039_v17 = vpop.eup %1352  ;;  %v706_v44 = vmul.f32 %v1966_v60, %v705_v36  ;;  %v805_v24 = vor.u32 1.1754944e-38, %v804_v14  ;;  %vm830_vm10 = vmor %vm828_vm9, %vm829_vm3  ;;  %v835_v26 = vor.u32 1.1754944e-38, %v834_v51 }
 0x128   : > { %vm664_vm12 = vweird.f32 %v1818_v5  ;;  %vm708_vm13 = vweird.f32 %v1899_v33  ;;  %v644_v55 = vmul.f32 %v2039_v17, %v1990_v16  ;;  %vm833_vm14 = vcmp.eq.f32.partialorder %v832_v49, 8.507059e+37 }
 0x129   : > { %v826_v20 = vmul.f32 %v1351_v13, %v825_v31  ;;  %v820_v31 = vor.u32 1.1754944e-38, %v819_v19  ;;  %vm679_vm15 = vweird.f32 %v1902_v35  ;;  %v806_v36 = vsel %vm2051_vm7, %v805_v24, %v801_v30 }
 0x12a   : > { %vm724_vm0 = vweird.f32 %v1992_v21  ;;  %vm739_vm2 = vweird.f32 %v1979_v59  ;;  %v737_v51 = vadd.f32 %v1979_v59, %v736_v9  ;;  %v855_v6 = vlaneseq }
 0x12b   : > { %v827_v10 = vadd.f32 %v1351_v13, %v826_v20  ;;  %v821_v41 = vsel %vm818_vm8, %v820_v31, %v816_v57  ;;  %v721_v20 = vmul.f32 %v1992_v21, %v720_v25  ;;  %vm678_vm3 = vweird.f32 %v1847_v28  ;;  %vm2098_vm8 = vmor %vm723_vm1, %vm724_vm0 }
 0x12c   : > { %v852_v39 = vmul.f32 %v821_v41, %v1814_v1  ;;  %v729_v19 = vand.u32 2147483648, %v1921_v54  ;;  %vm738_vm6 = vweird.f32 %v1914_v48  ;;  %v742_v62 = vand.u32 2147483647, %v1914_v48 }
 0x12d   : > { %v831_v37 = vsel %vm830_vm10, %v1351_v13, %v827_v10  ;;  %v2079_v13 = vld [vmem:[%s296_s8] ss:$0 sm:$0xff]  ;;  %v2364_v25 = vand.u32 2147483647, %v1822_v7  ;;  %v722_v49 = vadd.f32 %v1992_v21, %v721_v20  ;;  %v850_v31 = vmul.f32 %v2007_v27, %v1768_v34  ;;  %vm2110_vm10 = vmor %vm738_vm6, %vm739_vm2 }
 0x12e   : > { %v836_v57 = vsel %vm833_vm14, %v835_v26, %v831_v37  ;;  %v744_v26 = vand.u32 2147483648, %v1914_v48  ;;  %v2102_v48 = vshrl.u32 %v855_v6, 7  ;;  %vm709_vm9 = vweird.f32 %v1966_v60 }
 0x12f   : > { %v853_v14 = vmul.f32 %v836_v57, %v1852_v32  ;;  %vm2088_vm7 = vcmp.eq.f32.partialorder %v2364_v25, 8.507059e+37  ;;  %v851_v32 = vmul.f32 %v806_v36, %v1804_v61  ;;  %v712_v61 = vand.u32 2147483647, %v1899_v33 }
 0x130   : > { %v707_v54 = vadd.f32 %v1966_v60, %v706_v44  ;;  %v645_v9 = vsub.f32 1.0, %v644_v55  ;;  %v741_v10 = vsel %vm2110_vm10, %v1979_v59, %v737_v51  ;;  %vm2330_vm1 = vcmp.eq.s32.totalorder %v2102_v48, %v2079_v13  ;;  %vm2137_vm10 = vmor %vm693_vm4, %vm694_vm5  ;;  %v2402_v59 = vld [vmem:[#allocation19_spill] sm:$0xff] }
 0x131   : > { %v873_v23 = vpack.c.bf16 %v853_v14, %v852_v39  ;;  %vm604_vm0 = vweird.f32 %v1798_v58  ;;  %v714_v34 = vand.u32 2147483648, %v1899_v33  ;;  %v730_v27 = vor.u32 1.1754944e-38, %v729_v19  ;;  %vm2156_vm4 = vmor %vm708_vm13, %vm709_vm9  ;;  %v2408_v33 = vld [vmem:[#allocation20_spill] sm:$0xff] }
 0x132   : > { %v745_v24 = vor.u32 1.1754944e-38, %v744_v26  ;;  %v1579_v41 = vmov 0.0   ;;  %v2371_v55 = vand.u32 2147483647, %v1787_v50  ;;  %v726_v37 = vsel %vm2098_vm8, %v1992_v21, %v722_v49  ;;  %vm2172_vm13 = vmor %vm663_vm11, %vm664_vm12 }
 0x133   : > { %874 = vmatpush.bf16.msra.mxu1 %v873_v23  ;;  %v1151_v44 = vsel %vm2330_vm1, 1.0, %v1579_v41  ;;  %vm2144_vm1 = vcmp.eq.f32.partialorder %v727_v22, 8.507059e+37  ;;  %vm743_vm14 = vcmp.eq.f32.partialorder %v742_v62, 8.507059e+37  ;;  %v872_v57 = vpack.c.bf16 %v851_v32, %v850_v31  ;;  %vm2186_vm9 = vmor %vm678_vm3, %vm679_vm15 }
 0x134   : > { %vm2128_vm2 = vcmp.eq.f32.partialorder %v2371_v55, 8.507059e+37  ;;  %890 = vadd.xlane.f32.xlu0 %v1151_v44  ;;  %v677_v51 = vadd.f32 %v1902_v35, %v1995_v2  ;;  %vm633_vm6 = vweird.f32 %v1883_v12  ;;  %v637_v7 = vand.u32 2147483647, %v1883_v12 }
 0x135   : > { %v746_v22 = vsel %vm743_vm14, %v745_v24, %v741_v10  ;;  %v2380_v39 = vsub.f32 1.0, %v1977_v18  ;;  %vm634_vm5 = vweird.f32 %v1951_v4  ;;  %v711_v2 = vsel %vm2156_vm4, %v1966_v60, %v707_v54 }
 0x136   : > { %v646_v6 = vmul.f32 %v2039_v17, %v645_v9  ;;  %v696_v18 = vsel %vm2137_vm10, %v1868_v52, %v2003_v53  ;;  %vm713_vm8 = vcmp.eq.f32.partialorder %v712_v61, 8.507059e+37  ;;  %v715_v19 = vor.u32 1.1754944e-38, %v714_v34  ;;  %vm2205_vm15 = vmor %vm633_vm6, %vm634_vm5 }
 0x137   : > { %v631_v14 = vmul.f32 %v1951_v4, %v2380_v39  ;;  %875 = vmatpush.bf16.msra.mxu1 %v872_v57  ;;  %v731_v60 = vsel %vm2144_vm1, %v730_v27, %v726_v37  ;;  %vm648_vm11 = vweird.f32 %v1990_v16  ;;  %vm649_vm12 = vweird.f32 %v2039_v17  ;;  %v2403_v37 = vld [vmem:[#allocation23_spill] sm:$0xff]  ;;  %v2405_v57 = vld [vmem:[#allocation21_spill] sm:$0xff] }
 0x138   : > { %v847_v62 = vmul.f32 %v746_v22, %v1832_v11  ;;  %v871_v52 = vpack.c.bf16 %v2000_v15, %v1982_v45  ;;  %v681_v53 = vsel %vm2186_vm9, %v1902_v35, %v677_v51  ;;  %v639_v26 = vand.u32 2147483648, %v1883_v12  ;;  %vm2227_vm1 = vmor %vm648_vm11, %vm649_vm12 }
 0x139   : > { %v716_v25 = vsel %vm713_vm8, %v715_v19, %v711_v2  ;;  %v654_v32 = vand.u32 2147483648, %v1990_v16  ;;  %v632_v49 = vadd.f32 %v1951_v4, %v631_v14  ;;  %v647_v45 = vadd.f32 %v2039_v17, %v646_v6  ;;  %v2407_v2 = vld [vmem:[#allocation18_spill] sm:$0xff] }
 0x13a   : > { %v652_v15 = vand.u32 2147483647, %v1990_v16  ;;  %v846_v35 = vmul.f32 %v731_v60, %v1826_v8  ;;  %v666_v46 = vsel %vm2172_vm13, %v1818_v5, %v1896_v29  ;;  %v2387_v23 = vand.u32 2147483647, %v1847_v28 }
 0x13b   : > { %876 = vmatpush.bf16.msra.mxu1 %v871_v52  ;;  %v2388_v12 = vand.u32 2147483648, %v1847_v28  ;;  %v701_v61 = vsel %vm2088_vm7, %v2005_v42, %v696_v18  ;;  %v617_v5 = vadd.f32 %v1856_v40, %v1985_v56  ;;  %vm619_vm14 = vweird.f32 %v1856_v40 }
 0x13c   : > { %vm683_vm3 = vcmp.eq.f32.partialorder %v2387_v23, 8.507059e+37  ;;  %v845_v28 = vmul.f32 %v716_v25, %v1811_v0  ;;  %v870_v29 = vpack.c.bf16 %v847_v62, %v846_v35  ;;  %vm2235_vm6 = vcmp.eq.f32.partialorder %v637_v7, 8.507059e+37  ;;  %v2406_v7 = vld [vmem:[#allocation22_spill] sm:$0xff] }
 0x13d   : > { %v685_v31 = vor.u32 1.1754944e-38, %v2388_v12  ;;  %v640_v42 = vor.u32 1.1754944e-38, %v639_v26  ;;  %v655_v54 = vor.u32 1.1754944e-38, %v654_v32  ;;  %vm2393_vm7 = vweird.f32 %v1779_v43  ;;  %v865_v62 = vld [vmem:[#allocation2] sm:$0xff] }
 0x13e   : > { %vm2243_vm10 = vmor %vm2393_vm7, %vm604_vm0  ;;  %v844_v56 = vmul.f32 %v701_v61, %v1775_v38  ;;  %v636_v0 = vsel %vm2205_vm15, %v1951_v4, %v632_v49  ;;  %v651_v9 = vsel %vm2227_vm1, %v2039_v17, %v647_v45  ;;  %vm653_vm4 = vcmp.eq.f32.partialorder %v652_v15, 8.507059e+37 }
 0x13f   : > { %v686_v30 = vsel %vm683_vm3, %v685_v31, %v681_v53  ;;  %877 = vmatpush.bf16.msra.mxu1 %v870_v29  ;;  %v671_v10 = vsel %vm2128_vm2, %v1875_v3, %v666_v46  ;;  %vm2396_vm0 = vweird.f32 %v1808_v63  ;;  %v2399_v38 = vand.u32 2147483647, %v1779_v43 }
 0x140   : > { %vm2259_vm5 = vmor %vm2396_vm0, %vm619_vm14  ;;  %v843_v4 = vmul.f32 %v686_v30, %v1785_v47  ;;  %v869_v27 = vpack.c.bf16 %v845_v28, %v844_v56  ;;  %v2400_v17 = vand.u32 2147483648, %v1779_v43  ;;  %v2401_v41 = vand.u32 2147483648, %v1808_v63 }
 0x141   : > { %vm608_vm13 = vcmp.eq.f32.partialorder %v2399_v38, 8.507059e+37  ;;  %v641_v3 = vsel %vm2235_vm6, %v640_v42, %v636_v0  ;;  %v656_v55 = vsel %vm653_vm4, %v655_v54, %v651_v9  ;;  %v842_v20 = vmul.f32 %v671_v10, %v2402_v59 }
 0x142   : > { %v610_v24 = vor.u32 1.1754944e-38, %v2400_v17  ;;  %v625_v44 = vor.u32 1.1754944e-38, %v2401_v41  ;;  %v606_v36 = vsel %vm2243_vm10, %v1798_v58, %v2403_v37  ;;  %v621_v47 = vsel %vm2259_vm5, %v1856_v40, %v617_v5  ;;  %v889_v40 = vld [vmem:[#allocation3] sm:$0xff] }
 0x143   : > { %v2404_v43 = vand.u32 2147483647, %v1808_v63  ;;  %878 = vmatpush.bf16.msra.mxu1 %v869_v27  ;;  %v840_v51 = vmul.f32 %v641_v3, %v2405_v57  ;;  %v841_v21 = vmul.f32 %v656_v55, %v2406_v7  ;;  %v868_v22 = vpack.c.bf16 %v843_v4, %v842_v20 }
 0x144   : > { %v611_v39 = vsel %vm608_vm13, %v610_v24, %v606_v36  ;;  %vm2409_vm8 = vcmp.eq.s32.totalorder %v2102_v48, %v2079_v13  ;;  %v1580_v63 = vmov 1.0|1.0   ;;  %vm893_vm11 = vcmask 7168  }
 0x145   : > { %vm623_vm2 = vcmp.eq.f32.partialorder %v2404_v43, 8.507059e+37  ;;  %v838_v6 = vmul.f32 %v611_v39, %v2407_v2  ;;  %v867_v18 = vpack.c.bf16 %v841_v21, %v840_v51  ;;  %vm1152_vm9 = vmpackc.low %vm2409_vm8, %vm2409_vm8 }
 0x146   : > { %v626_v14 = vsel %vm623_vm2, %v625_v44, %v621_v47 }
 0x147   : > { %879 = vmatpush.bf16.msra.mxu1 %v868_v22  ;;  %v839_v58 = vmul.f32 %v626_v14, %v2408_v33 }
 0x149   : > { %v866_v19 = vpack.c.bf16 %v839_v58, %v838_v6 }
 0x14b   : > { %880 = vmatpush.bf16.msra.mxu1 %v867_v18 }
 0x14f   : > { %881 = vmatpush.bf16.msra.mxu1 %v866_v19 }
 0x152   : > { %1153 = vmatmul.msk.bf16.vlgmr.msra.gmra.mxu1 %vm1152_vm9, %v1580_v63 }
 0x1a7   : > { %v891_v60 = vpop.xlane.xlu0 %890 }
 0x1a8   : > { %v892_v50 = vadd.f32 %v891_v60, %v889_v40 }
 0x1aa   : > { %894 = vst.msk [vmem:[#allocation3] sm:$0xff] %vm893_vm11, %v892_v50 }
 0x1cf   : > { %v883_v52 = vpop.f32.mrf.mxu1 }
 0x1d0   : > { %v887_v53 = vadd.f32 %v883_v52, %v865_v62 }
 0x1d2   : > { %888 = vst [vmem:[#allocation2] sm:$0xff] %v887_v53 }
 0x1d3   : > { %898 = sbr.rel (%p1154_p1) target bundleno = 633 (0x279), region = 68 }
 0x1d7   : > { %v885_v26 = vpop.f32.mrf.mxu1 }
 0x1d8   : > { %v915_v25 = vld [vmem:[#allocation10 + $0x78] sm:$0xff]  ;;  %v914_v32 = vld [vmem:[#allocation10 + $0x70] sm:$0xff]  ;;  %v1581_v13 = vmov 0   ;;  %v913_v48 = vld [vmem:[#allocation10 + $0x68] sm:$0xff] }
 0x1d9   : > { %927 = vmatpush.msra.mxu0 %v915_v25  ;;  %1354 = vset.pattern.permute.xlu0 %v1581_v13  ;;  %v912_v49 = vld [vmem:[#allocation10 + $0x60] sm:$0xff]  ;;  %v916_v11 = vld [vmem:[#allocation3] sm:$0xff]  ;;  %v909_v35 = vld [vmem:[#allocation10 + $0x48] sm:$0xff] }
 0x1da   : > { %v911_v45 = vld [vmem:[#allocation10 + $0x58] sm:$0xff]  ;;  %920 = vperm.xlu0 %1354, %v916_v11   ;;  %v910_v15 = vld [vmem:[#allocation10 + $0x50] sm:$0xff]  ;;  %v908_v46 = vld [vmem:[#allocation10 + $0x40] sm:$0xff] }
 0x1db   : > { %928 = vmatpush.msra.mxu0 %v914_v32  ;;  %v907_v23 = vld [vmem:[#allocation10 + $0x38] sm:$0xff]  ;;  %v906_v12 = vld [vmem:[#allocation10 + $0x30] sm:$0xff]  ;;  %v905_v31 = vld [vmem:[#allocation10 + $0x28] sm:$0xff] }
 0x1dc   : > { %v904_v61 = vld [vmem:[#allocation10 + $0x20] sm:$0xff]  ;;  %v903_v8 = vld [vmem:[#allocation10 + $0x18] sm:$0xff]  ;;  %v902_v5 = vld [vmem:[#allocation10 + $0x10] sm:$0xff] }
 0x1dd   : > { %929 = vmatpush.msra.mxu0 %v913_v48  ;;  %v901_v28 = vld [vmem:[#allocation10 + $0x8] sm:$0xff]  ;;  %v900_v29 = vld [vmem:[#allocation10] sm:$0xff] }
 0x1de   : > { %v899_v30 = vld [vmem:[#allocation2] sm:$0xff] }
 0x1df   : > { %930 = vmatpush.msra.mxu0 %v912_v49  ;;  %v1355_v1 = vld [vmem:[%s2321_s5] ss:$0 sm:$0xff] }
 0x1e1   : > { %931 = vmatpush.msra.mxu0 %v911_v45 }
 0x1e3   : > { %932 = vmatpush.msra.mxu0 %v910_v15 }
 0x1e5   : > { %933 = vmatpush.msra.mxu0 %v909_v35 }
 0x1e7   : > { %934 = vmatpush.msra.mxu0 %v908_v46 }
 0x1e9   : > { %935 = vmatpush.msra.mxu0 %v907_v23 }
 0x1eb   : > { %936 = vmatpush.msra.mxu0 %v906_v12 }
 0x1ed   : > { %937 = vmatpush.msra.mxu0 %v905_v31 }
 0x1ef   : > { %938 = vmatpush.msra.mxu0 %v904_v61 }
 0x1f1   : > { %939 = vmatpush.msra.mxu0 %v903_v8 }
 0x1f3   : > { %940 = vmatpush.msra.mxu0 %v902_v5 }
 0x1f5   : > { %941 = vmatpush.msra.mxu0 %v901_v28 }
 0x1f7   : > { %942 = vmatpush.msra.mxu0 %v900_v29 }
 0x1f8   : > { %943 = vmatmul.f32.vlgmr.msra.gmra.mxu0 %v899_v30 }
 0x24c   : > { %v921_v42 = vpop.permute.xlu0 %920 }
 0x24d   : > { %v926_v54 = vmul.f32 %v1355_v1, %v921_v42 }
 0x275   : > { %v944_v16 = vpop.f32.mrf.mxu0 }
 0x276   : > { %v945_v56 = vadd.f32 %v944_v16, %v926_v54 }
 0x278   : > { %947 = vst [vmem:[#allocation12] sm:$0xff] %v945_v56 }
 0x279 PF: > { %p1227_p3 = scmp.eq.s32.totalorder %s1649_s27, 2  ;;  %s958_s18 = sshll.u32 %s2322_s6, 4  ;;  %s959_s18 = int_to_ptr.hbm [resolvable:$true] %s958_s18 }
 0x27a   : > { %s1582_s30 = smov [#allocation12]  }
 0x27b   : > { %s956_s20 = sshll.u32 %s1582_s30, 4  ;;  %s957_s20 = int_to_ptr.vmem [resolvable:$true] %s956_s20 }
 0x27c   : > { %1205 = dma.vmem_to_hbm [thread:$0]  (%p1227_p3), %s957_s20, 128, %s959_s18, [#allocation6]  }
 0x27d   : > { %1545 = dma.done.wait (%p1227_p3), [#allocation6], 128  }
 0x27e   : > { %1547 = vsyncadd (%p1227_p3), [#allocation6], 4294967168 }
 0x27f PF: > { %s24_s26 = sadd.s32 1, %s1570_s26   ;;  %s2410_s9 = smov %s1695_s21 }
 0x280   : > { %p21_p4 = scmp.ge.s32.totalorder %s24_s26, 5   ;;  %s2411_s21 = smov %s1554_s22 }
 0x281   : > { %s2412_s22 = smov %s1558_s23  ;;  %s2413_s23 = smov %s2410_s9 }
 0x282   : > { %s2414_s24 = smov %s1566_s25  ;;  %s2415_s25 = smov %s2417_s19 }
 0x283   :  { %23 = sbr.rel (!%p21_p4) target bundleno = 12 (0xc), region = 111 }
 0x288   :  { %972 = vsyncpa [#allocation5], 1 }
 0x289   :  { %974 = vsyncpa [#allocation5 + $0x1], 1 }
 0x28a   :  { %975 = vsyncpa [#allocation8], 1 }
 0x28b   :  { %977 = vsyncpa [#allocation8 + $0x1], 1 }
 0x28c   :  { %978 = vsyncpa [#allocation11], 1 }
 0x28d   :  { %979 = vsyncpa [#allocation6], 1 }
 0x28e   :  { %981 = vsyncpa [#allocation6 + $0x1], 1 }

</bundles_post_ra>
